<compile_context>
chip_gen: v7x
topology: tpu7x:2x2x1
jax: 0.10.0
libtpu: 0.0.40
codegen_flags: <defaults>
</compile_context>

<pallas_src>
import functools
import math

import jax
import jax.numpy as jnp
from jax.experimental import pallas as pl
from jax.experimental.pallas import tpu as pltpu


_MIN_GRID_STEPS = 8  # keep enough steps for DMA overlap + megacore sharding


def _round_up(x, m):
    return ((x + m - 1) // m) * m


def _round_down_to_8(x):
    return max(8, (x // 8) * 8)


def _layernorm_kernel(x_ref, a_ref, b_ref, o_ref, *, eps, feat, feat_padded):
    x = x_ref[...].astype(jnp.float32)                       # (TM, Fp)
    if feat_padded == feat:
        mean = jnp.mean(x, axis=-1, keepdims=True)            # (TM, 1)
        diff = x - mean
        sq = diff * diff
    else:
        # Feature axis was zero-padded to a lane-dense width in the wrapper:
        # padded lanes MUST NOT affect the statistics.
        lane = jax.lax.broadcasted_iota(jnp.int32, x.shape, dimension=1)
        valid = lane < feat
        mean = jnp.sum(x, axis=-1, keepdims=True) * (1.0 / feat)  # zeros pad OK
        diff = x - mean
        sq = jnp.where(valid, diff * diff, 0.0)
    # torch.std default is unbiased (divides by N-1); guard feat == 1
    # (torch would return NaN there — documented divergence).
    denom = max(feat - 1, 1)
    var = jnp.sum(sq, axis=-1, keepdims=True) * (1.0 / denom)
    std = jnp.sqrt(var)                                        # (TM, 1)
    # Per-row reciprocal (exact, to hold 1e-5 tolerance) instead of a
    # per-element (TM, Fp) divide.
    inv = pl.reciprocal(std + eps, approx=False)               # (TM, 1)
    # Fused scale/shift; a_ref/b_ref are f32 (1, Fp), zero in padded lanes.
    y = diff * inv * a_ref[...] + b_ref[...]
    o_ref[...] = y.astype(o_ref.dtype)


def _vmem_config():
    """(vmem_limit_bytes, pipeline_budget_bytes) derived from the chip."""
    cap = 64 * 1024 * 1024  # conservative default: v7x per-TC VMEM
    try:
        cap = int(pltpu.get_tpu_info().vmem_capacity_bytes)
    except Exception:
        pass
    # v7x (64 MiB/TC) -> 48 MiB limit; v5e/v6e (128 MiB/TC) -> 64 MiB limit.
    vmem_limit = min((3 * cap) // 4, 64 * 1024 * 1024)
    # Leave headroom for Mosaic internal scratch / a,b buffers / regalloc.
    pipeline_budget = max(8 * 1024 * 1024, vmem_limit - 16 * 1024 * 1024)
    return vmem_limit, pipeline_budget


def _pick_row_tile(rows, feat_padded, itemsize, pipeline_budget):
    """Largest multiple-of-8 row tile whose footprint fits the budget:
    2 in + 2 out double-buffered DMA tiles plus ~3 live f32 intermediates
    (x.astype(f32), diff, y) per element."""
    bytes_per_row = feat_padded * (4 * itemsize + 3 * 4)
    tm = pipeline_budget // max(bytes_per_row, 1)
    tm = _round_down_to_8(tm)
    # Cap so the grid has at least _MIN_GRID_STEPS steps (when the problem
    # is big enough) — needed for prefetch/compute overlap and so v7x can
    # shard the single "parallel" row axis across its 2 TensorCores.
    steps_cap = _round_down_to_8(pl.cdiv(rows, _MIN_GRID_STEPS))
    tm = min(tm, steps_cap)
    # Never larger than the (8-row padded) problem itself.
    tm = min(tm, _round_up(rows, 8))
    return max(tm, 8)


def layer_norm(x, a_2, b_2, eps=1e-6):
    """LayerNorm over the last axis of x (any leading shape)."""
    orig_shape = x.shape
    feat = orig_shape[-1]
    rows = math.prod(orig_shape[:-1]) if len(orig_shape) > 1 else 1

    x2 = x.reshape(rows, feat)
    a2 = a_2.reshape(1, feat).astype(jnp.float32)   # pre-cast once in wrapper
    b2 = b_2.reshape(1, feat).astype(jnp.float32)

    # Lane density: pad the feature axis to a multiple of 128 so every vreg is
    # full and stores are unmasked vst; padded lanes are masked out of the
    # statistics inside the kernel and sliced off at the end.
    feat_padded = _round_up(feat, 128)
    if feat_padded != feat:
        x2 = jnp.pad(x2, ((0, 0), (0, feat_padded - feat)))
        a2 = jnp.pad(a2, ((0, 0), (0, feat_padded - feat)))
        b2 = jnp.pad(b2, ((0, 0), (0, feat_padded - feat)))

    itemsize = jnp.dtype(x.dtype).itemsize
    vmem_limit, pipeline_budget = _vmem_config()
    tm = _pick_row_tile(rows, feat_padded, itemsize, pipeline_budget)

    # Ragged last row-block handled by Pallas (no row padding, no out slice).
    grid = pl.cdiv(rows, tm)

    kernel = functools.partial(_layernorm_kernel, eps=eps, feat=feat,
                               feat_padded=feat_padded)
    out = pl.pallas_call(
        kernel,
        out_shape=jax.ShapeDtypeStruct((rows, feat_padded), x.dtype),
        grid_spec=pltpu.PrefetchScalarGridSpec(
            num_scalar_prefetch=0,
            grid=(grid,),
            in_specs=[
                pl.BlockSpec((tm, feat_padded), lambda i: (i, 0)),
                pl.BlockSpec((1, feat_padded), lambda i: (0, 0)),
                pl.BlockSpec((1, feat_padded), lambda i: (0, 0)),
            ],
            out_specs=pl.BlockSpec((tm, feat_padded), lambda i: (i, 0)),
        ),
        compiler_params=pltpu.CompilerParams(
            dimension_semantics=("parallel",),
            vmem_limit_bytes=vmem_limit,
        ),
    )(x2, a2, b2)

    if feat_padded != feat:
        out = out[:, :feat]
    return out.reshape(orig_shape)


def _reference_layer_norm(x, a_2, b_2, eps=1e-6):
    xf = x.astype(jnp.float32)
    mean = jnp.mean(xf, axis=-1, keepdims=True)
    # unbiased std, matching torch.std default
    denom = max(x.shape[-1] - 1, 1)
    var = jnp.sum((xf - mean) ** 2, axis=-1, keepdims=True) / denom
    std = jnp.sqrt(var)
    return (a_2 * (xf - mean) / (std + eps) + b_2).astype(x.dtype)


if __name__ == "__main__":
    key = jax.random.PRNGKey(0)

    # Main demo shape implied by the BERT-style module.
    batch, seq, hidden = 2, 8, 32
    x = jax.random.normal(key, (batch, seq, hidden), dtype=jnp.float32)
    # Deterministic params matching nn.Parameter(ones) / nn.Parameter(zeros)
    a_2 = jnp.ones((hidden,), dtype=jnp.float32)
    b_2 = jnp.zeros((hidden,), dtype=jnp.float32)

    out = layer_norm(x, a_2, b_2, eps=1e-6)
    out = jax.block_until_ready(out)
    ref = _reference_layer_norm(x, a_2, b_2, eps=1e-6)
    assert out.shape == x.shape
    assert jnp.allclose(out, ref, atol=1e-5, rtol=1e-5)

    # Extra check: lane-aligned features + ragged (non-divisible) row count,
    # exercising the cdiv-grid masked last block and the feat%128==0 path.
    k2 = jax.random.PRNGKey(1)
    x2 = jax.random.normal(k2, (3, 5, 256), dtype=jnp.float32)
    a2p = 1.0 + 0.01 * jnp.arange(256, dtype=jnp.float32)
    b2p = 0.01 * jnp.arange(256, dtype=jnp.float32)
    out2 = jax.block_until_ready(layer_norm(x2, a2p, b2p, eps=1e-6))
    ref2 = _reference_layer_norm(x2, a2p, b2p, eps=1e-6)
    assert out2.shape == x2.shape
    assert jnp.allclose(out2, ref2, atol=1e-5, rtol=1e-5)

    print("KERNEL_OK")
</pallas_src>

<mosaic_0001>
module attributes {stable_mosaic.version = 11 : i64} {
  func.func @_layernorm_kernel(%arg0: i32, %arg1: memref<8x128xf32, #tpu.memory_space<vmem>>, %arg2: memref<1x128xf32, #tpu.memory_space<vmem>>, %arg3: memref<1x128xf32, #tpu.memory_space<vmem>>, %arg4: memref<8x128xf32, #tpu.memory_space<vmem>>) attributes {dimension_semantics = [#tpu.dimension_semantics<parallel>], iteration_bounds = array<i64: 2>, scalar_prefetch = 0 : i64, scratch_operands = 0 : i64, tpu.core_type = #tpu.core_type<tc>, window_params = [{transform_indices = @transform_0, window_bounds = array<i64: 8, 128>}, {pipeline_mode = #tpu.pipeline_mode<synchronous>, transform_indices = @transform_1, window_bounds = array<i64: 1, 128>}, {pipeline_mode = #tpu.pipeline_mode<synchronous>, transform_indices = @transform_2, window_bounds = array<i64: 1, 128>}, {transform_indices = @transform_3, window_bounds = array<i64: 8, 128>}]} {
    %c0 = arith.constant 0 : index
    %c0_0 = arith.constant 0 : index
    %0 = vector.load %arg1[%c0, %c0_0] : memref<8x128xf32, #tpu.memory_space<vmem>>, vector<8x128xf32>
    %1 = tpu.iota {dimensions = array<i32: 1>} : vector<8x128xi32>
    %c32_i32 = arith.constant 32 : i32
    %2 = vector.broadcast %c32_i32 : i32 to vector<8x128xi32>
    %3 = arith.cmpi slt, %1, %2 : vector<8x128xi32>
    %cst = arith.constant dense<0.000000e+00> : vector<8xf32>
    %4 = vector.multi_reduction <add>, %0, %cst [1] : vector<8x128xf32> to vector<8xf32>
    %5 = vector.shape_cast %4 : vector<8xf32> to vector<8x1xf32>
    %cst_1 = arith.constant 3.125000e-02 : f32
    %6 = vector.broadcast %cst_1 : f32 to vector<8x1xf32>
    %7 = arith.mulf %5, %6 : vector<8x1xf32>
    %8 = vector.broadcast %7 : vector<8x1xf32> to vector<8x128xf32>
    %9 = arith.subf %0, %8 : vector<8x128xf32>
    %10 = arith.mulf %9, %9 : vector<8x128xf32>
    %cst_2 = arith.constant 0.000000e+00 : f32
    %11 = vector.broadcast %cst_2 : f32 to vector<8x128xf32>
    %12 = arith.select %3, %10, %11 : vector<8x128xi1>, vector<8x128xf32>
    %cst_3 = arith.constant dense<0.000000e+00> : vector<8xf32>
    %13 = vector.multi_reduction <add>, %12, %cst_3 [1] : vector<8x128xf32> to vector<8xf32>
    %14 = vector.shape_cast %13 : vector<8xf32> to vector<8x1xf32>
    %cst_4 = arith.constant 0.0322580636 : f32
    %15 = vector.broadcast %cst_4 : f32 to vector<8x1xf32>
    %16 = arith.mulf %14, %15 : vector<8x1xf32>
    %17 = math.sqrt %16 : vector<8x1xf32>
    %cst_5 = arith.constant 9.99999997E-7 : f32
    %18 = vector.broadcast %cst_5 : f32 to vector<8x1xf32>
    %19 = arith.addf %17, %18 : vector<8x1xf32>
    %20 = tpu.reciprocal %19 : vector<8x1xf32> -> vector<8x1xf32>
    %21 = vector.broadcast %20 : vector<8x1xf32> to vector<8x128xf32>
    %22 = arith.mulf %9, %21 : vector<8x128xf32>
    %c0_6 = arith.constant 0 : index
    %c0_7 = arith.constant 0 : index
    %23 = vector.load %arg2[%c0_6, %c0_7] : memref<1x128xf32, #tpu.memory_space<vmem>>, vector<1x128xf32>
    %24 = vector.broadcast %23 : vector<1x128xf32> to vector<8x128xf32>
    %25 = arith.mulf %22, %24 : vector<8x128xf32>
    %c0_8 = arith.constant 0 : index
    %c0_9 = arith.constant 0 : index
    %26 = vector.load %arg3[%c0_8, %c0_9] : memref<1x128xf32, #tpu.memory_space<vmem>>, vector<1x128xf32>
    %27 = vector.broadcast %26 : vector<1x128xf32> to vector<8x128xf32>
    %28 = arith.addf %25, %27 : vector<8x128xf32>
    %c0_10 = arith.constant 0 : index
    %c0_11 = arith.constant 0 : index
    %29 = vector.load %arg4[%c0_10, %c0_11] : memref<8x128xf32, #tpu.memory_space<vmem>>, vector<8x128xf32>
    tpu.vector_store %arg4[%c0_10, %c0_11], %28 {strides = array<i32>} : memref<8x128xf32, #tpu.memory_space<vmem>>, vector<8x128xf32>,
    return
  }
  func.func @transform_0(%arg0: i32) -> (i32, i32) {
    %c0_i32 = arith.constant 0 : i32
    %c0_i32_0 = arith.constant 0 : i32
    return %arg0, %c0_i32 : i32, i32
  }
  func.func @transform_1(%arg0: i32) -> (i32, i32) {
    %c0_i32 = arith.constant 0 : i32
    %c0_i32_0 = arith.constant 0 : i32
    %c0_i32_1 = arith.constant 0 : i32
    return %c0_i32, %c0_i32_0 : i32, i32
  }
  func.func @transform_2(%arg0: i32) -> (i32, i32) {
    %c0_i32 = arith.constant 0 : i32
    %c0_i32_0 = arith.constant 0 : i32
    %c0_i32_1 = arith.constant 0 : i32
    return %c0_i32, %c0_i32_0 : i32, i32
  }
  func.func @transform_3(%arg0: i32) -> (i32, i32) {
    %c0_i32 = arith.constant 0 : i32
    %c0_i32_0 = arith.constant 0 : i32
    return %arg0, %c0_i32 : i32, i32
  }
}

</mosaic_0001>

<bundles_post_ra>
// kernel: tpu_custom_call.1
= control target key start
LH: loop header
LB: loop body
LE: loop exit
PB: predicated region body
PF: predicated region fallthrough
CT: control target
= control target key end

     0   :  { %8 = vsyncpa [#allocation3], 0  ;;  %s665_s0 = inlined_call_operand.hbm [shape: f32[16,128], index: 0, kind: input, shape index: {}]   ;;  %s666_s1 = inlined_call_operand.vmem [shape: f32[1,128], index: 1, kind: input, shape index: {}]   ;;  %s667_s2 = inlined_call_operand.vmem [shape: f32[1,128], index: 2, kind: input, shape index: {}]   ;;  %s668_s3 = inlined_call_operand.hbm [shape: f32[16,128], index: 3, kind: output, shape index: {}]  }
   0x1   :  { %10 = vsyncpa [#allocation3 + $0x1], 0 }
   0x2   :  { %11 = vsyncpa [#allocation4], 0 }
   0x3   :  { %13 = vsyncpa [#allocation4 + $0x1], 0  ;;  %s494_s12 = smov 0   ;;  %s496_s13 = smov 0  }
   0x4   :  { %s498_s14 = smov 0   ;;  %s500_s15 = smov 0  }
   0x5 LB: > { %s515_s16 = sadd.s32 4294967295, %s470_s15   ;;  %s310_s17 = sadd.s32 4294967294, %s470_s15   ;;  %s470_s15 = sphi %s500_s15, %s683_s15   ;;  %s466_s14 = sphi %s498_s14, %s682_s14   ;;  %s462_s13 = sphi %s496_s13, %s681_s13   ;;  %s458_s12 = sphi %s494_s12, %s680_s12  }
   0x6   : > { %s519_s18 = sadd.s32 1, %s470_s15   ;;  %s26_s19 = sadd.s32 1, %s466_s14 }
   0x7   : > { %s23_s20 = ssub.s32 %s470_s15, %s519_s18  ;;  %p33_p0 = scmp.ne.s32.totalorder %s466_s14, %s462_s13 }
   0x8   : > { %p24_p1 = scmp.eq.s32.totalorder %s23_s20, 0  ;;  %p34_p2 = scmp.eq.s32.totalorder %s470_s15, 0 }
   0x9   : > { %p39_p3 = scmp.ne.s32.totalorder %s462_s13, %s458_s12  ;;  %p40_p4 = scmp.eq.s32.totalorder %s515_s16, 0 }
   0xa   : > { %s531_s21 = scalar_select %p24_p1, %s466_s14, %s26_s19  }
   0xb   : > { %p533_p5 = por %p34_p2, %p33_p0  ;;  %p537_p6 = por %p40_p4, %p39_p3 }
   0xc   : > { %p105_p7 = scmp.eq.s32.totalorder %s515_s16, 1  ;;  %p111_p8 = scmp.eq.s32.totalorder %s310_s17, 1 }
   0xd   : > { %p336_p10 = scmp.lt.s32.totalorder %s470_s15, 2  ;;  %s137_s26 = sand.u32 1, %s466_s14  }
   0xe   : > { %p544_p11 = por %p105_p7, %p33_p0  ;;  %p548_p12 = por %p111_p8, %p39_p3 }
   0xf   : > { %s314_s27 = sshll.u32 %s470_s15, 7  ;;  %s313_s28 = sshll.u32 %s137_s26, 3 }
  0x10   : > { %s672_s24 = scalar_select %p544_p11, 1, 0 }
  0x11   : > { %s673_s25 = scalar_select %p548_p12, 1, 0 }
  0x12   : > { %s557_s4 = scalar_lea.hbm %s665_s0, %s314_s27  ;;  %s141_s5 = scalar_lea.vmem [#allocation2], %s313_s28 }
  0x13   : > { %s148_s6 = sshll.u32 %s141_s5, 4  ;;  %p561_p13 = pnand %p336_p10, %p533_p5  ;;  %s565_s6 = int_to_ptr.vmem [resolvable:$true] %s148_s6 }
  0x14   : > { %s138_s8 = scalar_lea.sflag [#allocation3], %s137_s26  ;;  %s374_s9 = scalar_lea.hbm %s557_s4, 128 }
  0x15   : > { %p375_p2 = scmp.ne.s32.totalorder %s557_s4, %s374_s9  ;;  %p376_p3 = pneg %p561_p13 }
  0x16   : > { %s379_s17 = scalar_lea.hbm %s665_s0, 256  ;;  %p380_p5 = scmp.lt.u32.totalorder %s557_s4, %s665_s0 }
  0x17   : > { %p377_p4 = pnand %p376_p3, %p375_p2  ;;  %p381_p8 = scmp.lt.u32.totalorder %s379_s17, %s374_s9 }
  0x18   : > { %p383_p9 = scmp.lt.u32.totalorder %s374_s9, %s557_s4 }
  0x19   : > { %p378_p7 = pneg %p377_p4  ;;  %p382_p10 = por %p381_p8, %p380_p5 }
  0x1b   : > { %p384_p0 = por %p383_p9, %p382_p10 }
  0x1d   : > { %p385_p1 = pnand %p384_p0, %p378_p7 }
  0x1f   : > { %388 = shalt.err (!%p385_p1)
}
  0x20   : > { %s389_s22 = scalar_lea.vmem %s565_s6, 128  ;;  %s472_s26 = smov [#allocation2]  }
  0x21   : > { %p390_p2 = scmp.ne.s32.totalorder %s565_s6, %s389_s22  ;;  %s394_s27 = sshll.u32 %s472_s26, 4  ;;  %s395_s27 = int_to_ptr.vmem [resolvable:$false] %s394_s27 }
  0x22   : > { %s396_s28 = scalar_lea.vmem %s395_s27, 256  ;;  %p397_p11 = scmp.lt.s32.totalorder %s565_s6, %s395_s27 }
  0x23   : > { %p392_p4 = pnand %p390_p2, %p376_p3  ;;  %p398_p5 = scmp.lt.s32.totalorder %s396_s28, %s389_s22 }
  0x25   : > { %p393_p12 = pneg %p392_p4  ;;  %p399_p8 = por %p398_p5, %p397_p11 }
  0x27   : > { %p400_p9 = pnand %p399_p8, %p393_p12 }
  0x29   : > { %403 = shalt.err (!%p400_p9)
}
  0x2a   : > { %331 = dma.hbm_to_vmem [thread:$0]  (!%p561_p13), %s557_s4, 128, %s565_s6, %s138_s8  }
  0x2b   : > { %p675_p0 = scmp.lt.s32.totalorder %s470_s15, 3  ;;  %p676_p1 = scmp.ge.s32.totalorder %s470_s15, 1 }
  0x2d   : > { %p154_p3 = pnand %p676_p1, %p675_p0 }
  0x2e   : > { %s599_s29 = sand.u32 (!%p154_p3), 1, %s462_s13  }
  0x2f   : > { %157 = sbr.rel (%p154_p3) target bundleno = 397 (0x18d), region = 32  ;;  %s316_s30 = sshll.u32 (!%p154_p3), %s599_s29, 3 }
  0x30   : > { %s160_s5 = scalar_lea.sflag (!%p154_p3), [#allocation3], %s599_s29  ;;  %s163_s7 = scalar_lea.vmem (!%p154_p3), [#allocation2], %s316_s30 }
  0x36   : > { %449 = dma.done.wait (%p537_p6), %s160_s5, 128  }
  0x37   : > { %451 = vsyncadd (%p537_p6), %s160_s5, 4294967168  ;;  %v186_v0 = vld [vmem:[%s163_s7] sm:$0xff]  ;;  %v187_v1 = vlaneseq  ;;  %s321_s9 = sshll.u32 %s515_s16, 7  ;;  %s185_s10 = scalar_lea.vmem [#allocation5], %s316_s30 }
  0x38   : > { %190 = vadd.xlane.f32.xlu0 %v186_v0  ;;  %v318_v17 = vld [vmem:[%s666_s1] ss:$0 sm:$0xff]  ;;  %s240_s11 = sshll.u32 %s185_s10, 4  ;;  %s621_s20 = scalar_lea.hbm %s668_s3, %s321_s9  ;;  %s623_s11 = int_to_ptr.vmem [resolvable:$true] %s240_s11 }
  0x39   : > { %v188_v3 = vand.u32 127, %v187_v1  ;;  %v319_v19 = vld [vmem:[%s667_s2] ss:$0 sm:$0xff]  ;;  %s227_s22 = scalar_lea.sflag [#allocation4], %s599_s29  ;;  %s404_s26 = scalar_lea.vmem %s623_s11, 128 }
  0x3a   : > { %p405_p6 = scmp.ne.s32.totalorder %s623_s11, %s404_s26  ;;  %p677_p11 = scmp.ne.s32.totalorder %s672_s24, 0 }
  0x3b   : > { %vm189_vm0 = vcmp.lt.s32.totalorder %v188_v3, 32  ;;  %s473_s16 = smov [#allocation5]  }
  0x3c   : > { %p406_p12 = pnand %p405_p6, %p677_p11  ;;  %s408_s27 = sshll.u32 %s473_s16, 4  ;;  %s409_s27 = int_to_ptr.vmem [resolvable:$false] %s408_s27 }
  0x3d   : > { %s410_s28 = scalar_lea.vmem %s409_s27, 256  ;;  %p411_p7 = scmp.lt.s32.totalorder %s623_s11, %s409_s27 }
  0x3e   : > { %p407_p13 = pneg %p406_p12  ;;  %p412_p10 = scmp.lt.s32.totalorder %s410_s28, %s404_s26 }
  0x40   : > { %p413_p2 = por %p412_p10, %p411_p7 }
  0x42   : > { %p414_p4 = pnand %p413_p2, %p407_p13 }
  0xc5   : > { %v191_v2 = vpop.xlane.xlu0 %190 }
  0xc6   : > { %v192_v4 = vmul.f32 0.03125, %v191_v2 }
  0xc8   : > { %v193_v5 = vsub.f32 %v186_v0, %v192_v4 }
  0xca   : > { %v194_v6 = vmul.f32 %v193_v5, %v193_v5 }
  0xcc   : > { %v195_v7 = vsel %vm189_vm0, %v194_v6, 0.0 }
  0xcd   : > { %196 = vadd.xlane.f32.xlu0 %v195_v7 }
 0x15a   : > { %v197_v8 = vpop.xlane.xlu0 %196 }
 0x15b   : > { %v198_v9 = vmul.f32 0.032258064, %v197_v8 }
 0x15d   : > { %370 = vrsqrt.f32 %v198_v9  ;;  %vm201_vm1 = vcmp.eq.f32.partialorder %v198_v9, inf  ;;  %v204_v12 = vand.u32 2147483648, %v198_v9  ;;  %vm203_vm2 = vcmp.eq.f32.partialorder %v198_v9, 0.0 }
 0x167   : > { %v371_v10 = vpop.eup %370 }
 0x168   : > { %v200_v11 = vmul.f32 %v371_v10, %v198_v9 }
 0x16a   : > { %v202_v13 = vsel %vm201_vm1, %v198_v9, %v200_v11 }
 0x16b   : > { %v205_v14 = vsel %vm203_vm2, %v204_v12, %v202_v13 }
 0x16c   : > { %v206_v15 = vadd.f32 1e-06, %v205_v14 }
 0x16e   : > { %372 = vrcp.f32 %v206_v15 }
 0x178   : > { %v373_v16 = vpop.eup %372 }
 0x179   : > { %v208_v18 = vmul.f32 %v373_v16, %v193_v5 }
 0x17b   : > { %v216_v20 = vmul.f32 %v318_v17, %v208_v18 }
 0x17d   : > { %v224_v21 = vadd.f32 %v319_v19, %v216_v20 }
 0x17f   : > { %225 = vst [vmem:[%s185_s10] sm:$0xff] %v224_v21 }
 0x180   : > { %417 = shalt.err (!%p414_p4)
}
 0x181   : > { %s418_s29 = scalar_lea.hbm %s621_s20, 128  ;;  %s422_s7 = scalar_lea.hbm %s668_s3, 256 }
 0x182   : > { %p419_p5 = scmp.ne.s32.totalorder %s621_s20, %s418_s29  ;;  %p423_p0 = scmp.lt.u32.totalorder %s621_s20, %s668_s3 }
 0x183   : > { %p424_p1 = scmp.lt.u32.totalorder %s422_s7, %s418_s29  ;;  %p426_p6 = scmp.lt.u32.totalorder %s418_s29, %s621_s20 }
 0x184   : > { %p420_p8 = pnand %p419_p5, %p677_p11 }
 0x185   : > { %p425_p3 = por %p424_p1, %p423_p0 }
 0x186   : > { %p421_p9 = pneg %p420_p8 }
 0x187   : > { %p427_p12 = por %p426_p6, %p425_p3 }
 0x189   : > { %p428_p13 = pnand %p427_p12, %p421_p9 }
 0x18b   : > { %431 = shalt.err (!%p428_p13)
}
 0x18c   : > { %326 = dma.vmem_to_hbm [thread:$0]  (%p677_p11), %s623_s11, 128, %s621_s20, %s227_s22  }
 0x18d PF: > { %s252_s6 = sand.u32 1, %s458_s12   ;;  %p678_p7 = scmp.ne.s32.totalorder %s673_s25, 0 }
 0x18e   : > { %p679_p10 = scmp.ge.s32.totalorder %s470_s15, 2  ;;  %s253_s8 = scalar_lea.sflag [#allocation4], %s252_s6 }
 0x190   : > { %p333_p2 = pnand %p679_p10, %p678_p7 }
 0x192   : > { %453 = dma.done.wait (!%p333_p2), %s253_s8, 128  }
 0x193   : > { %455 = vsyncadd (!%p333_p2), %s253_s8, 4294967168  ;;  %p16_p4 = scmp.ge.s32.totalorder %s519_s18, 4   ;;  %s680_s12 = smov %s462_s13 }
 0x194   : > { %s681_s13 = smov %s466_s14  ;;  %s682_s14 = smov %s531_s21 }
 0x195   : > { %s683_s15 = smov %s519_s18  ;;  %18 = sbr.rel (!%p16_p4) target bundleno = 5 (0x5), region = 77 }
 0x19c   :  { %258 = vsyncpa [#allocation3], 1 }
 0x19d   :  { %260 = vsyncpa [#allocation3 + $0x1], 1 }
 0x19e   :  { %261 = vsyncpa [#allocation4], 1 }
 0x19f   :  { %263 = vsyncpa [#allocation4 + $0x1], 1 }

</bundles_post_ra>
